<compile_context>
chip_gen: v7x
topology: tpu7x:2x2x1
jax: 0.10.0
libtpu: 0.0.40
codegen_flags: <defaults>
</compile_context>

<pallas_src>
import math

import jax
import jax.numpy as jnp
from jax import lax
from jax.experimental import pallas as pl
from jax.experimental.pallas import tpu as pltpu


def _layernorm(z, g, b, eps=1e-5):
    mu = jnp.mean(z, axis=-1, keepdims=True)
    var = jnp.mean((z - mu) ** 2, axis=-1, keepdims=True)
    return (z - mu) * jax.lax.rsqrt(var + eps) * g + b


# Batched-matmul dimension numbers (batch dim 0 = heads).
_DN_AB = (((2,), (1,)), ((0,), (0,)))    # 'hnk,hkm->hnm'  (A @ B   per head)
_DN_ABT = (((2,), (2,)), ((0,), (0,)))   # 'hqd,hkd->hqk'  (A @ B^T per head, no transpose op)


def block_kernel(x_ref, g1_ref, b1_ref, wqkv_ref, wproj_ref, bproj_ref,
                 g2_ref, b2_ref, wfc1_ref, bfc1_ref, wfc2_ref, bfc2_ref,
                 out_ref, amap_ref):
    # One grid step == one batch element. Refs carry a single (N, C) slab.
    x = x_ref[0]                                   # (N, C) f32
    N, C = x.shape
    H = amap_ref.shape[1]
    Ns = amap_ref.shape[2]
    Dh = C // H
    crop = N - Ns                                  # == 2 * t_h * t_w

    # ---- norm1 (f32 VPU/EUP math), then ONE fused lane-dense qkv matmul ----
    xn = _layernorm(x, g1_ref[...], b1_ref[...]).astype(jnp.bfloat16)
    qkv = jnp.dot(xn, wqkv_ref[...],
                  preferred_element_type=jnp.float32).astype(jnp.bfloat16)   # (N, 3C)

    def heads(m):                                  # (N, C) -> (H, N, Dh), batch-leading
        return jnp.transpose(m.reshape(N, H, Dh), (1, 0, 2))

    q = heads(qkv[:, :C])                          # scale already folded into w_q columns
    k = heads(qkv[:, C:2 * C])
    v = heads(qkv[:, 2 * C:])

    # ---- attention scores + (deferred-normalization) softmax, all heads at once ----
    s = lax.dot_general(q, k, _DN_ABT, preferred_element_type=jnp.float32)   # (H, N, N)
    # TODO(synk): on v6e/v7x run the exp/max/sum in bf16 (bf16 EUP/VPU); keep f32 on v5e.
    p = jnp.exp(s - jnp.max(s, axis=-1, keepdims=True))                      # unnormalized
    inv = pl.reciprocal(jnp.sum(p, axis=-1, keepdims=True), approx=True)     # (H, N, 1)

    # Lane-dense attention-map store: crop only the query (sublane) dim here, key dim is
    # cropped in the wrapper; map emitted as bf16.
    amap_ref[0] = (p[:, crop:, :] * inv[:, crop:, :]).astype(amap_ref.dtype)

    # ---- attention output (normalize after the matmul) + full-K output projection ----
    o = lax.dot_general(p.astype(jnp.bfloat16), v, _DN_AB,
                        preferred_element_type=jnp.float32) * inv            # (H, N, Dh)
    o_cat = jnp.transpose(o.astype(jnp.bfloat16), (1, 0, 2)).reshape(N, C)   # (N, C)
    y = jnp.dot(o_cat, wproj_ref[...], preferred_element_type=jnp.float32)   # K = C
    x1 = x + y + bproj_ref[...]

    # ---- norm2 + MLP (exact erf-GELU, f32 elementwise) + residual ----
    xn2 = _layernorm(x1, g2_ref[...], b2_ref[...])
    h1 = jnp.dot(xn2.astype(jnp.bfloat16), wfc1_ref[...],
                 preferred_element_type=jnp.float32) + bfc1_ref[...]
    h1 = 0.5 * h1 * (1.0 + jax.lax.erf(h1 * jnp.float32(1.0 / math.sqrt(2.0))))
    y2 = jnp.dot(h1.astype(jnp.bfloat16), wfc2_ref[...],
                 preferred_element_type=jnp.float32) + bfc2_ref[...]
    out_ref[0] = x1 + y2


def block_forward(x, params, t_h, t_w, num_heads):
    B, N, C = x.shape
    H = num_heads
    Dh = C // H
    Hm = params["w_fc1"].shape[1]
    crop = 2 * t_h * t_w
    Ns = N - crop
    bf16 = jnp.bfloat16
    scale = Dh ** -0.5

    # Host-side weight re-layout (one-time XLA ops, free at steady state).
    # torch qkv output columns are ordered (3, H, Dh); fold the attention scale into Wq.
    w3 = params["w_qkv"].reshape(C, 3, H, Dh)
    w_q = (w3[:, 0] * scale).reshape(C, C)
    w_k = w3[:, 1].reshape(C, C)
    w_v = w3[:, 2].reshape(C, C)
    w_qkv = jnp.concatenate([w_q, w_k, w_v], axis=1).astype(bf16)   # (C, 3C), lane-dense
    w_proj = params["w_proj"].astype(bf16)                          # (C, C); rows = (H, Dh)
    w_fc1 = params["w_fc1"].astype(bf16)
    w_fc2 = params["w_fc2"].astype(bf16)

    def full(shape):
        nd = len(shape)
        return pl.BlockSpec(shape, lambda b, _nd=nd: (0,) * _nd)   # constant -> VMEM-resident

    in_specs = [
        pl.BlockSpec((1, N, C), lambda b: (b, 0, 0)),              # x
        full((1, C)), full((1, C)),                                # norm1 gamma, beta
        full((C, 3 * C)),                                          # fused Wqkv (bf16)
        full((C, C)), full((1, C)),                                # Wproj (bf16), bias
        full((1, C)), full((1, C)),                                # norm2 gamma, beta
        full((C, Hm)), full((1, Hm)),                              # fc1 (bf16), bias
        full((Hm, C)), full((1, C)),                               # fc2 (bf16), bias
    ]
    out_specs = [
        pl.BlockSpec((1, N, C), lambda b: (b, 0, 0)),
        pl.BlockSpec((1, H, Ns, N), lambda b: (b, 0, 0, 0)),       # query-cropped, full keys
    ]

    # VMEM budget: resident weights + double-buffered I/O blocks + activation working set,
    # clamped to 75% of this generation's physical VMEM (queried, not hard-coded).
    weight_bytes = (4 * C * C + 2 * C * Hm) * 2 + (6 * C + Hm) * 4
    io_bytes = 2 * (2 * N * C * 4 + H * Ns * N * 2)
    act_bytes = (N * 3 * C * 6                      # fused qkv (f32 + bf16)
                 + 3 * H * N * Dh * 2               # q, k, v
                 + 2 * H * N * N * 4 + H * N * N * 2  # s, p f32 + p bf16
                 + H * N * Dh * 6 + N * C * 2       # o (f32 + bf16), o_cat
                 + 5 * N * C * 4 + N * Hm * 6)      # residuals / norms / MLP hidden
    need = weight_bytes + io_bytes + act_bytes
    try:
        cap = getattr(pltpu.get_tpu_info(), "vmem_capacity_bytes", 64 << 20)
    except Exception:
        cap = 64 << 20
    vmem_limit = int(min(max(1.3 * need, 32 << 20), int(0.75 * cap)))

    # TODO(synk): for large N (esp. v7x 64 MiB VMEM) tile the attention flash-style over
    # query blocks / add a head grid axis, which also gives v7x's second TensorCore work
    # when B is small or odd.
    out, amap_full = pl.pallas_call(
        block_kernel,
        out_shape=(
            jax.ShapeDtypeStruct((B, N, C), jnp.float32),
            jax.ShapeDtypeStruct((B, H, Ns, N), jnp.bfloat16),
        ),
        grid_spec=pltpu.PrefetchScalarGridSpec(
            num_scalar_prefetch=0,
            grid=(B,),
            in_specs=in_specs,
            out_specs=out_specs,
        ),
        compiler_params=pltpu.CompilerParams(
            dimension_semantics=("parallel",),
            vmem_limit_bytes=vmem_limit,
        ),
    )(x, params["g1"], params["b1"], w_qkv, w_proj, params["b_proj"],
      params["g2"], params["b2"], w_fc1, params["b_fc1"], w_fc2, params["b_fc2"])

    # Key-dim crop done lane-dense outside the kernel (plain XLA slice on the bf16 map).
    return out, amap_full[:, :, :, crop:]


def ref_forward(x, params, t_h, t_w, num_heads):
    """Pure-JAX f32 reference for correctness checking."""
    B, N, C = x.shape
    Dh = C // num_heads
    xn = _layernorm(x, params["g1"][0], params["b1"][0])
    qkv = xn @ params["w_qkv"]                                    # (B, N, 3C)
    qkv = qkv.reshape(B, N, 3, num_heads, Dh).transpose(2, 0, 3, 1, 4)
    q, k, v = qkv[0], qkv[1], qkv[2]                              # (B, H, N, Dh)
    attn = jnp.einsum("bhqd,bhkd->bhqk", q, k) * (Dh ** -0.5)
    attn = jax.nn.softmax(attn, axis=-1)
    o = jnp.einsum("bhqk,bhkd->bhqd", attn, v).transpose(0, 2, 1, 3).reshape(B, N, C)
    x1 = x + (o @ params["w_proj"] + params["b_proj"][0])
    xn2 = _layernorm(x1, params["g2"][0], params["b2"][0])
    h1 = xn2 @ params["w_fc1"] + params["b_fc1"][0]
    h1 = 0.5 * h1 * (1.0 + jax.lax.erf(h1 / jnp.sqrt(2.0)))
    out = x1 + (h1 @ params["w_fc2"] + params["b_fc2"][0])
    s = 2 * t_h * t_w
    return out, attn[:, :, s:, s:]


if __name__ == "__main__":
    B, N, C = 2, 8, 32
    num_heads = 4
    mlp_ratio = 4.0
    Hm = int(C * mlp_ratio)
    t_h, t_w = 1, 1

    key = jax.random.PRNGKey(0)
    ks = jax.random.split(key, 10)
    params = {
        "g1": jnp.ones((1, C), jnp.float32),
        "b1": jnp.zeros((1, C), jnp.float32),
        # qkv_bias=False by default -> no qkv bias
        "w_qkv": 0.05 * jax.random.normal(ks[1], (C, 3 * C), jnp.float32),
        "w_proj": 0.05 * jax.random.normal(ks[2], (C, C), jnp.float32),
        "b_proj": 0.01 * jax.random.normal(ks[3], (1, C), jnp.float32),
        "g2": jnp.ones((1, C), jnp.float32),
        "b2": jnp.zeros((1, C), jnp.float32),
        "w_fc1": 0.05 * jax.random.normal(ks[4], (C, Hm), jnp.float32),
        "b_fc1": 0.01 * jax.random.normal(ks[5], (1, Hm), jnp.float32),
        "w_fc2": 0.05 * jax.random.normal(ks[6], (Hm, C), jnp.float32),
        "b_fc2": 0.01 * jax.random.normal(ks[7], (1, C), jnp.float32),
    }
    x = jax.random.normal(ks[0], (B, N, C), jnp.float32)

    out, attn_map = block_forward(x, params, t_h, t_w, num_heads)
    out = jax.block_until_ready(out)
    attn_map = jax.block_until_ready(attn_map)

    ref_out, ref_attn = ref_forward(x, params, t_h, t_w, num_heads)
    Ns = N - 2 * t_h * t_w
    assert out.shape == (B, N, C)
    assert attn_map.shape == (B, num_heads, Ns, Ns)
    # bf16 MXU operands (f32 accumulation) vs. the f32 reference -> loosened tolerances;
    # attn map is stored in bf16 with an approx-reciprocal softmax denominator.
    assert jnp.allclose(out, ref_out, atol=2e-2, rtol=2e-2), \
        float(jnp.max(jnp.abs(out - ref_out)))
    assert jnp.allclose(attn_map.astype(jnp.float32), ref_attn, atol=1e-2, rtol=2e-2), \
        float(jnp.max(jnp.abs(attn_map.astype(jnp.float32) - ref_attn)))
    print("KERNEL_OK")
</pallas_src>

<mosaic_0001>
module attributes {stable_mosaic.version = 11 : i64} {
  func.func @block_kernel(%arg0: i32, %arg1: memref<1x8x32xf32, #tpu.memory_space<vmem>>, %arg2: memref<1x32xf32, #tpu.memory_space<vmem>>, %arg3: memref<1x32xf32, #tpu.memory_space<vmem>>, %arg4: memref<32x96xbf16, #tpu.memory_space<vmem>>, %arg5: memref<32x32xbf16, #tpu.memory_space<vmem>>, %arg6: memref<1x32xf32, #tpu.memory_space<vmem>>, %arg7: memref<1x32xf32, #tpu.memory_space<vmem>>, %arg8: memref<1x32xf32, #tpu.memory_space<vmem>>, %arg9: memref<32x128xbf16, #tpu.memory_space<vmem>>, %arg10: memref<1x128xf32, #tpu.memory_space<vmem>>, %arg11: memref<128x32xbf16, #tpu.memory_space<vmem>>, %arg12: memref<1x32xf32, #tpu.memory_space<vmem>>, %arg13: memref<1x8x32xf32, #tpu.memory_space<vmem>>, %arg14: memref<1x4x6x8xbf16, #tpu.memory_space<vmem>>) attributes {dimension_semantics = [#tpu.dimension_semantics<parallel>], iteration_bounds = array<i64: 2>, scalar_prefetch = 0 : i64, scratch_operands = 0 : i64, tpu.core_type = #tpu.core_type<tc>, window_params = [{transform_indices = @transform_0, window_bounds = array<i64: 1, 8, 32>}, {pipeline_mode = #tpu.pipeline_mode<synchronous>, transform_indices = @transform_1, window_bounds = array<i64: 1, 32>}, {pipeline_mode = #tpu.pipeline_mode<synchronous>, transform_indices = @transform_2, window_bounds = array<i64: 1, 32>}, {pipeline_mode = #tpu.pipeline_mode<synchronous>, transform_indices = @transform_3, window_bounds = array<i64: 32, 96>}, {pipeline_mode = #tpu.pipeline_mode<synchronous>, transform_indices = @transform_4, window_bounds = array<i64: 32, 32>}, {pipeline_mode = #tpu.pipeline_mode<synchronous>, transform_indices = @transform_5, window_bounds = array<i64: 1, 32>}, {pipeline_mode = #tpu.pipeline_mode<synchronous>, transform_indices = @transform_6, window_bounds = array<i64: 1, 32>}, {pipeline_mode = #tpu.pipeline_mode<synchronous>, transform_indices = @transform_7, window_bounds = array<i64: 1, 32>}, {pipeline_mode = #tpu.pipeline_mode<synchronous>, transform_indices = @transform_8, window_bounds = array<i64: 32, 128>}, {pipeline_mode = #tpu.pipeline_mode<synchronous>, transform_indices = @transform_9, window_bounds = array<i64: 1, 128>}, {pipeline_mode = #tpu.pipeline_mode<synchronous>, transform_indices = @transform_10, window_bounds = array<i64: 128, 32>}, {pipeline_mode = #tpu.pipeline_mode<synchronous>, transform_indices = @transform_11, window_bounds = array<i64: 1, 32>}, {transform_indices = @transform_12, window_bounds = array<i64: 1, 8, 32>}, {transform_indices = @transform_13, window_bounds = array<i64: 1, 4, 6, 8>}]} {
    %c0 = arith.constant 0 : index
    %c0_0 = arith.constant 0 : index
    %c0_1 = arith.constant 0 : index
    %0 = vector.load %arg1[%c0, %c0_0, %c0_1] : memref<1x8x32xf32, #tpu.memory_space<vmem>>, vector<1x8x32xf32>
    %1 = vector.shape_cast %0 : vector<1x8x32xf32> to vector<8x32xf32>
    %c0_2 = arith.constant 0 : index
    %c0_3 = arith.constant 0 : index
    %2 = vector.load %arg2[%c0_2, %c0_3] : memref<1x32xf32, #tpu.memory_space<vmem>>, vector<1x32xf32>
    %c0_4 = arith.constant 0 : index
    %c0_5 = arith.constant 0 : index
    %3 = vector.load %arg3[%c0_4, %c0_5] : memref<1x32xf32, #tpu.memory_space<vmem>>, vector<1x32xf32>
    %cst = arith.constant dense<0.000000e+00> : vector<8xf32>
    %4 = vector.multi_reduction <add>, %1, %cst [1] : vector<8x32xf32> to vector<8xf32>
    %5 = vector.shape_cast %4 : vector<8xf32> to vector<8x1xf32>
    %cst_6 = arith.constant 3.200000e+01 : f32
    %6 = vector.broadcast %cst_6 : f32 to vector<8x1xf32>
    %7 = arith.divf %5, %6 : vector<8x1xf32>
    %8 = vector.broadcast %7 : vector<8x1xf32> to vector<8x32xf32>
    %9 = arith.subf %1, %8 : vector<8x32xf32>
    %10 = arith.mulf %9, %9 : vector<8x32xf32>
    %cst_7 = arith.constant dense<0.000000e+00> : vector<8xf32>
    %11 = vector.multi_reduction <add>, %10, %cst_7 [1] : vector<8x32xf32> to vector<8xf32>
    %12 = vector.shape_cast %11 : vector<8xf32> to vector<8x1xf32>
    %cst_8 = arith.constant 3.200000e+01 : f32
    %13 = vector.broadcast %cst_8 : f32 to vector<8x1xf32>
    %14 = arith.divf %12, %13 : vector<8x1xf32>
    %15 = vector.broadcast %7 : vector<8x1xf32> to vector<8x32xf32>
    %16 = arith.subf %1, %15 : vector<8x32xf32>
    %cst_9 = arith.constant 9.99999974E-6 : f32
    %17 = vector.broadcast %cst_9 : f32 to vector<8x1xf32>
    %18 = arith.addf %14, %17 : vector<8x1xf32>
    %19 = math.rsqrt %18 : vector<8x1xf32>
    %20 = vector.broadcast %19 : vector<8x1xf32> to vector<8x32xf32>
    %21 = arith.mulf %16, %20 : vector<8x32xf32>
    %22 = vector.broadcast %2 : vector<1x32xf32> to vector<8x32xf32>
    %23 = arith.mulf %21, %22 : vector<8x32xf32>
    %24 = vector.broadcast %3 : vector<1x32xf32> to vector<8x32xf32>
    %25 = arith.addf %23, %24 : vector<8x32xf32>
    %26 = arith.truncf %25 : vector<8x32xf32> to vector<8x32xbf16>
    %c0_10 = arith.constant 0 : index
    %c0_11 = arith.constant 0 : index
    %27 = vector.load %arg4[%c0_10, %c0_11] : memref<32x96xbf16, #tpu.memory_space<vmem>>, vector<32x96xbf16>
    %cst_12 = arith.constant dense<0.000000e+00> : vector<8x96xf32>
    %28 = tpu.matmul %26, %27, %cst_12 {dimension_numbers = #tpu.dot_dimension_numbers<[1], [0], [0], [1], [0, 0, 1, 1], [], []>} : vector<8x32xbf16>, vector<32x96xbf16>, vector<8x96xf32> -> vector<8x96xf32>
    %29 = arith.truncf %28 : vector<8x96xf32> to vector<8x96xbf16>
    %30 = vector.extract_strided_slice %29 {offsets = [0, 0], sizes = [8, 32], strides = [1, 1]} : vector<8x96xbf16> to vector<8x32xbf16>
    %31 = vector.shape_cast %30 : vector<8x32xbf16> to vector<8x4x8xbf16>
    %32 = tpu.transpose %31, [1, 0, 2] : vector<8x4x8xbf16> -> vector<4x8x8xbf16>
    %33 = vector.extract_strided_slice %29 {offsets = [0, 32], sizes = [8, 32], strides = [1, 1]} : vector<8x96xbf16> to vector<8x32xbf16>
    %34 = vector.shape_cast %33 : vector<8x32xbf16> to vector<8x4x8xbf16>
    %35 = tpu.transpose %34, [1, 0, 2] : vector<8x4x8xbf16> -> vector<4x8x8xbf16>
    %36 = vector.extract_strided_slice %29 {offsets = [0, 64], sizes = [8, 32], strides = [1, 1]} : vector<8x96xbf16> to vector<8x32xbf16>
    %37 = vector.shape_cast %36 : vector<8x32xbf16> to vector<8x4x8xbf16>
    %38 = tpu.transpose %37, [1, 0, 2] : vector<8x4x8xbf16> -> vector<4x8x8xbf16>
    %cst_13 = arith.constant dense<0.000000e+00> : vector<4x8x8xf32>
    %39 = tpu.matmul %32, %35, %cst_13 {dimension_numbers = #tpu.dot_dimension_numbers<[2], [2], [1], [1], [0, 0, 0, 1, 1, 1], [0], [0]>} : vector<4x8x8xbf16>, vector<4x8x8xbf16>, vector<4x8x8xf32> -> vector<4x8x8xf32>
    %cst_14 = arith.constant dense<0xFF800000> : vector<4x8xf32>
    %40 = vector.multi_reduction <maximumf>, %39, %cst_14 [2] : vector<4x8x8xf32> to vector<4x8xf32>
    %41 = vector.shape_cast %40 : vector<4x8xf32> to vector<4x8x1xf32>
    %42 = vector.broadcast %41 : vector<4x8x1xf32> to vector<4x8x8xf32>
    %43 = arith.subf %39, %42 : vector<4x8x8xf32>
    %44 = math.exp %43 : vector<4x8x8xf32>
    %cst_15 = arith.constant dense<0.000000e+00> : vector<4x8xf32>
    %45 = vector.multi_reduction <add>, %44, %cst_15 [2] : vector<4x8x8xf32> to vector<4x8xf32>
    %46 = vector.shape_cast %45 : vector<4x8xf32> to vector<4x8x1xf32>
    %47 = tpu.reciprocal %46 {approx = true} : vector<4x8x1xf32> -> vector<4x8x1xf32>
    %48 = vector.extract_strided_slice %44 {offsets = [0, 2, 0], sizes = [4, 6, 8], strides = [1, 1, 1]} : vector<4x8x8xf32> to vector<4x6x8xf32>
    %49 = vector.extract_strided_slice %47 {offsets = [0, 2, 0], sizes = [4, 6, 1], strides = [1, 1, 1]} : vector<4x8x1xf32> to vector<4x6x1xf32>
    %50 = vector.broadcast %49 : vector<4x6x1xf32> to vector<4x6x8xf32>
    %51 = arith.mulf %48, %50 : vector<4x6x8xf32>
    %52 = arith.truncf %51 : vector<4x6x8xf32> to vector<4x6x8xbf16>
    %c0_16 = arith.constant 0 : index
    %c0_17 = arith.constant 0 : index
    %c0_18 = arith.constant 0 : index
    %c0_19 = arith.constant 0 : index
    %53 = vector.load %arg14[%c0_16, %c0_17, %c0_18, %c0_19] : memref<1x4x6x8xbf16, #tpu.memory_space<vmem>>, vector<1x4x6x8xbf16>
    %54 = vector.shape_cast %53 : vector<1x4x6x8xbf16> to vector<4x6x8xbf16>
    %55 = vector.shape_cast %52 : vector<4x6x8xbf16> to vector<1x4x6x8xbf16>
    tpu.vector_store %arg14[%c0_16, %c0_17, %c0_18, %c0_19], %55 {strides = array<i32>} : memref<1x4x6x8xbf16, #tpu.memory_space<vmem>>, vector<1x4x6x8xbf16>,
    %56 = arith.truncf %44 : vector<4x8x8xf32> to vector<4x8x8xbf16>
    %cst_20 = arith.constant dense<0.000000e+00> : vector<4x8x8xf32>
    %57 = tpu.matmul %56, %38, %cst_20 {dimension_numbers = #tpu.dot_dimension_numbers<[2], [1], [1], [2], [0, 0, 0, 1, 1, 2], [0], [0]>} : vector<4x8x8xbf16>, vector<4x8x8xbf16>, vector<4x8x8xf32> -> vector<4x8x8xf32>
    %58 = vector.broadcast %47 : vector<4x8x1xf32> to vector<4x8x8xf32>
    %59 = arith.mulf %57, %58 : vector<4x8x8xf32>
    %60 = arith.truncf %59 : vector<4x8x8xf32> to vector<4x8x8xbf16>
    %61 = tpu.transpose %60, [1, 0, 2] : vector<4x8x8xbf16> -> vector<8x4x8xbf16>
    %62 = vector.shape_cast %61 : vector<8x4x8xbf16> to vector<8x32xbf16>
    %c0_21 = arith.constant 0 : index
    %c0_22 = arith.constant 0 : index
    %63 = vector.load %arg5[%c0_21, %c0_22] : memref<32x32xbf16, #tpu.memory_space<vmem>>, vector<32x32xbf16>
    %cst_23 = arith.constant dense<0.000000e+00> : vector<8x32xf32>
    %64 = tpu.matmul %62, %63, %cst_23 {dimension_numbers = #tpu.dot_dimension_numbers<[1], [0], [0], [1], [0, 0, 1, 1], [], []>} : vector<8x32xbf16>, vector<32x32xbf16>, vector<8x32xf32> -> vector<8x32xf32>
    %65 = arith.addf %1, %64 : vector<8x32xf32>
    %c0_24 = arith.constant 0 : index
    %c0_25 = arith.constant 0 : index
    %66 = vector.load %arg6[%c0_24, %c0_25] : memref<1x32xf32, #tpu.memory_space<vmem>>, vector<1x32xf32>
    %67 = vector.broadcast %66 : vector<1x32xf32> to vector<8x32xf32>
    %68 = arith.addf %65, %67 : vector<8x32xf32>
    %c0_26 = arith.constant 0 : index
    %c0_27 = arith.constant 0 : index
    %69 = vector.load %arg7[%c0_26, %c0_27] : memref<1x32xf32, #tpu.memory_space<vmem>>, vector<1x32xf32>
    %c0_28 = arith.constant 0 : index
    %c0_29 = arith.constant 0 : index
    %70 = vector.load %arg8[%c0_28, %c0_29] : memref<1x32xf32, #tpu.memory_space<vmem>>, vector<1x32xf32>
    %cst_30 = arith.constant dense<0.000000e+00> : vector<8xf32>
    %71 = vector.multi_reduction <add>, %68, %cst_30 [1] : vector<8x32xf32> to vector<8xf32>
    %72 = vector.shape_cast %71 : vector<8xf32> to vector<8x1xf32>
    %cst_31 = arith.constant 3.200000e+01 : f32
    %73 = vector.broadcast %cst_31 : f32 to vector<8x1xf32>
    %74 = arith.divf %72, %73 : vector<8x1xf32>
    %75 = vector.broadcast %74 : vector<8x1xf32> to vector<8x32xf32>
    %76 = arith.subf %68, %75 : vector<8x32xf32>
    %77 = arith.mulf %76, %76 : vector<8x32xf32>
    %cst_32 = arith.constant dense<0.000000e+00> : vector<8xf32>
    %78 = vector.multi_reduction <add>, %77, %cst_32 [1] : vector<8x32xf32> to vector<8xf32>
    %79 = vector.shape_cast %78 : vector<8xf32> to vector<8x1xf32>
    %cst_33 = arith.constant 3.200000e+01 : f32
    %80 = vector.broadcast %cst_33 : f32 to vector<8x1xf32>
    %81 = arith.divf %79, %80 : vector<8x1xf32>
    %82 = vector.broadcast %74 : vector<8x1xf32> to vector<8x32xf32>
    %83 = arith.subf %68, %82 : vector<8x32xf32>
    %cst_34 = arith.constant 9.99999974E-6 : f32
    %84 = vector.broadcast %cst_34 : f32 to vector<8x1xf32>
    %85 = arith.addf %81, %84 : vector<8x1xf32>
    %86 = math.rsqrt %85 : vector<8x1xf32>
    %87 = vector.broadcast %86 : vector<8x1xf32> to vector<8x32xf32>
    %88 = arith.mulf %83, %87 : vector<8x32xf32>
    %89 = vector.broadcast %69 : vector<1x32xf32> to vector<8x32xf32>
    %90 = arith.mulf %88, %89 : vector<8x32xf32>
    %91 = vector.broadcast %70 : vector<1x32xf32> to vector<8x32xf32>
    %92 = arith.addf %90, %91 : vector<8x32xf32>
    %93 = arith.truncf %92 : vector<8x32xf32> to vector<8x32xbf16>
    %c0_35 = arith.constant 0 : index
    %c0_36 = arith.constant 0 : index
    %94 = vector.load %arg9[%c0_35, %c0_36] : memref<32x128xbf16, #tpu.memory_space<vmem>>, vector<32x128xbf16>
    %cst_37 = arith.constant dense<0.000000e+00> : vector<8x128xf32>
    %95 = tpu.matmul %93, %94, %cst_37 {dimension_numbers = #tpu.dot_dimension_numbers<[1], [0], [0], [1], [0, 0, 1, 1], [], []>} : vector<8x32xbf16>, vector<32x128xbf16>, vector<8x128xf32> -> vector<8x128xf32>
    %c0_38 = arith.constant 0 : index
    %c0_39 = arith.constant 0 : index
    %96 = vector.load %arg10[%c0_38, %c0_39] : memref<1x128xf32, #tpu.memory_space<vmem>>, vector<1x128xf32>
    %97 = vector.broadcast %96 : vector<1x128xf32> to vector<8x128xf32>
    %98 = arith.addf %95, %97 : vector<8x128xf32>
    %cst_40 = arith.constant 5.000000e-01 : f32
    %99 = vector.broadcast %cst_40 : f32 to vector<8x128xf32>
    %100 = arith.mulf %99, %98 : vector<8x128xf32>
    %cst_41 = arith.constant 0.707106769 : f32
    %101 = vector.broadcast %cst_41 : f32 to vector<8x128xf32>
    %102 = arith.mulf %98, %101 : vector<8x128xf32>
    %103 = math.erf %102 : vector<8x128xf32>
    %cst_42 = arith.constant 1.000000e+00 : f32
    %104 = vector.broadcast %cst_42 : f32 to vector<8x128xf32>
    %105 = arith.addf %104, %103 : vector<8x128xf32>
    %106 = arith.mulf %100, %105 : vector<8x128xf32>
    %107 = arith.truncf %106 : vector<8x128xf32> to vector<8x128xbf16>
    %c0_43 = arith.constant 0 : index
    %c0_44 = arith.constant 0 : index
    %108 = vector.load %arg11[%c0_43, %c0_44] : memref<128x32xbf16, #tpu.memory_space<vmem>>, vector<128x32xbf16>
    %cst_45 = arith.constant dense<0.000000e+00> : vector<8x32xf32>
    %109 = tpu.matmul %107, %108, %cst_45 {dimension_numbers = #tpu.dot_dimension_numbers<[1], [0], [0], [1], [0, 0, 1, 1], [], []>} : vector<8x128xbf16>, vector<128x32xbf16>, vector<8x32xf32> -> vector<8x32xf32>
    %c0_46 = arith.constant 0 : index
    %c0_47 = arith.constant 0 : index
    %110 = vector.load %arg12[%c0_46, %c0_47] : memref<1x32xf32, #tpu.memory_space<vmem>>, vector<1x32xf32>
    %111 = vector.broadcast %110 : vector<1x32xf32> to vector<8x32xf32>
    %112 = arith.addf %109, %111 : vector<8x32xf32>
    %113 = arith.addf %68, %112 : vector<8x32xf32>
    %c0_48 = arith.constant 0 : index
    %c0_49 = arith.constant 0 : index
    %c0_50 = arith.constant 0 : index
    %114 = vector.load %arg13[%c0_48, %c0_49, %c0_50] : memref<1x8x32xf32, #tpu.memory_space<vmem>>, vector<1x8x32xf32>
    %115 = vector.shape_cast %114 : vector<1x8x32xf32> to vector<8x32xf32>
    %116 = vector.shape_cast %113 : vector<8x32xf32> to vector<1x8x32xf32>
    tpu.vector_store %arg13[%c0_48, %c0_49, %c0_50], %116 {strides = array<i32>} : memref<1x8x32xf32, #tpu.memory_space<vmem>>, vector<1x8x32xf32>,
    return
  }
  func.func @transform_0(%arg0: i32) -> (i32, i32, i32) {
    %c0_i32 = arith.constant 0 : i32
    %c0_i32_0 = arith.constant 0 : i32
    %c0_i32_1 = arith.constant 0 : i32
    return %arg0, %c0_i32, %c0_i32_0 : i32, i32, i32
  }
  func.func @transform_1(%arg0: i32) -> (i32, i32) {
    %c0_i32 = arith.constant 0 : i32
    %c0_i32_0 = arith.constant 0 : i32
    %c0_i32_1 = arith.constant 0 : i32
    return %c0_i32, %c0_i32_0 : i32, i32
  }
  func.func @transform_2(%arg0: i32) -> (i32, i32) {
    %c0_i32 = arith.constant 0 : i32
    %c0_i32_0 = arith.constant 0 : i32
    %c0_i32_1 = arith.constant 0 : i32
    return %c0_i32, %c0_i32_0 : i32, i32
  }
  func.func @transform_3(%arg0: i32) -> (i32, i32) {
    %c0_i32 = arith.constant 0 : i32
    %c0_i32_0 = arith.constant 0 : i32
    %c0_i32_1 = arith.constant 0 : i32
    return %c0_i32, %c0_i32_0 : i32, i32
  }
  func.func @transform_4(%arg0: i32) -> (i32, i32) {
    %c0_i32 = arith.constant 0 : i32
    %c0_i32_0 = arith.constant 0 : i32
    %c0_i32_1 = arith.constant 0 : i32
    return %c0_i32, %c0_i32_0 : i32, i32
  }
  func.func @transform_5(%arg0: i32) -> (i32, i32) {
    %c0_i32 = arith.constant 0 : i32
    %c0_i32_0 = arith.constant 0 : i32
    %c0_i32_1 = arith.constant 0 : i32
    return %c0_i32, %c0_i32_0 : i32, i32
  }
  func.func @transform_6(%arg0: i32) -> (i32, i32) {
    %c0_i32 = arith.constant 0 : i32
    %c0_i32_0 = arith.constant 0 : i32
    %c0_i32_1 = arith.constant 0 : i32
    return %c0_i32, %c0_i32_0 : i32, i32
  }
  func.func @transform_7(%arg0: i32) -> (i32, i32) {
    %c0_i32 = arith.constant 0 : i32
    %c0_i32_0 = arith.constant 0 : i32
    %c0_i32_1 = arith.constant 0 : i32
    return %c0_i32, %c0_i32_0 : i32, i32
  }
  func.func @transform_8(%arg0: i32) -> (i32, i32) {
    %c0_i32 = arith.constant 0 : i32
    %c0_i32_0 = arith.constant 0 : i32
    %c0_i32_1 = arith.constant 0 : i32
    return %c0_i32, %c0_i32_0 : i32, i32
  }
  func.func @transform_9(%arg0: i32) -> (i32, i32) {
    %c0_i32 = arith.constant 0 : i32
    %c0_i32_0 = arith.constant 0 : i32
    %c0_i32_1 = arith.constant 0 : i32
    return %c0_i32, %c0_i32_0 : i32, i32
  }
  func.func @transform_10(%arg0: i32) -> (i32, i32) {
    %c0_i32 = arith.constant 0 : i32
    %c0_i32_0 = arith.constant 0 : i32
    %c0_i32_1 = arith.constant 0 : i32
    return %c0_i32, %c0_i32_0 : i32, i32
  }
  func.func @transform_11(%arg0: i32) -> (i32, i32) {
    %c0_i32 = arith.constant 0 : i32
    %c0_i32_0 = arith.constant 0 : i32
    %c0_i32_1 = arith.constant 0 : i32
    return %c0_i32, %c0_i32_0 : i32, i32
  }
  func.func @transform_12(%arg0: i32) -> (i32, i32, i32) {
    %c0_i32 = arith.constant 0 : i32
    %c0_i32_0 = arith.constant 0 : i32
    %c0_i32_1 = arith.constant 0 : i32
    return %arg0, %c0_i32, %c0_i32_0 : i32, i32, i32
  }
  func.func @transform_13(%arg0: i32) -> (i32, i32, i32, i32) {
    %c0_i32 = arith.constant 0 : i32
    %c0_i32_0 = arith.constant 0 : i32
    %c0_i32_1 = arith.constant 0 : i32
    %c0_i32_2 = arith.constant 0 : i32
    return %arg0, %c0_i32, %c0_i32_0, %c0_i32_1 : i32, i32, i32, i32
  }
}

</mosaic_0001>

<bundles_post_ra>
// kernel: tpu_custom_call.1
= control target key start
LH: loop header
LB: loop body
LE: loop exit
PB: predicated region body
PF: predicated region fallthrough
CT: control target
= control target key end

     0   :  { %s2896_s0 = inlined_call_operand.vmem [shape: f32[2,8,32], index: 0, kind: input, shape index: {}]   ;;  %s2897_s1 = inlined_call_operand.vmem [shape: f32[1,32], index: 1, kind: input, shape index: {}]   ;;  %s2898_s2 = inlined_call_operand.vmem [shape: f32[1,32], index: 2, kind: input, shape index: {}]   ;;  %s2899_s3 = inlined_call_operand.vmem [shape: bf16[32,96], index: 3, kind: input, shape index: {}]   ;;  %s2900_s4 = inlined_call_operand.vmem [shape: bf16[32,32], index: 4, kind: input, shape index: {}]   ;;  %s2901_s5 = inlined_call_operand.vmem [shape: f32[1,32], index: 5, kind: input, shape index: {}]   ;;  %s2902_s6 = inlined_call_operand.vmem [shape: f32[1,32], index: 6, kind: input, shape index: {}]   ;;  %s2903_s7 = inlined_call_operand.vmem [shape: f32[1,32], index: 7, kind: input, shape index: {}]   ;;  %s2904_s8 = inlined_call_operand.vmem [shape: bf16[32,128], index: 8, kind: input, shape index: {}]   ;;  %s2905_s9 = inlined_call_operand.vmem [shape: f32[1,128], index: 9, kind: input, shape index: {}]   ;;  %s2906_s10 = inlined_call_operand.vmem [shape: bf16[128,32], index: 10, kind: input, shape index: {}]   ;;  %s2907_s11 = inlined_call_operand.vmem [shape: f32[1,32], index: 11, kind: input, shape index: {}]   ;;  %s2908_s12 = inlined_call_operand.hbm [shape: f32[2,8,32], index: 12, kind: output, shape index: {0}]   ;;  %s2909_s13 = inlined_call_operand.vmem [shape: bf16[2,4,6,8], index: 13, kind: output, shape index: {1}]  }
   0x1   :  { %2910 = sst [smem:[#allocation5_spill]] %s2896_s0 }
   0x2   :  { %2911 = sst [smem:[#allocation6_spill]] %s2897_s1 }
   0x3   :  { %2912 = sst [smem:[#allocation7_spill]] %s2898_s2 }
   0x4   :  { %19 = vsyncpa [#allocation3], 0 }
   0x5   :  { %21 = vsyncpa [#allocation3 + $0x1], 0  ;;  %s2490_s25 = smov 0   ;;  %s2492_s26 = smov 0  }
   0x6   :  { %s2494_s27 = smov 0   ;;  %s2496_s28 = smov 0  }
   0x7 LB: > { %s2511_s29 = sadd.s32 4294967295, %s2404_s28   ;;  %s2071_s30 = sadd.s32 4294967294, %s2404_s28   ;;  %s2404_s28 = sphi %s2496_s28, %s2921_s28   ;;  %s2400_s27 = sphi %s2494_s27, %s2920_s27   ;;  %s2396_s26 = sphi %s2492_s26, %s2919_s26   ;;  %s2392_s25 = sphi %s2490_s25, %s2918_s25  }
   0x8   : > { %s2515_s14 = sadd.s32 1, %s2404_s28   ;;  %s291_s15 = sadd.s32 1, %s2400_s27 }
   0x9   : > { %s288_s16 = ssub.s32 %s2404_s28, %s2515_s14  ;;  %p301_p0 = scmp.ne.s32.totalorder %s2400_s27, %s2396_s26 }
   0xa   : > { %p289_p1 = scmp.eq.s32.totalorder %s288_s16, 0  ;;  %p302_p2 = scmp.eq.s32.totalorder %s2511_s29, 1 }
   0xb   : > { %p307_p3 = scmp.ne.s32.totalorder %s2396_s26, %s2392_s25  ;;  %p308_p4 = scmp.eq.s32.totalorder %s2071_s30, 1 }
   0xc   : > { %s2526_s17 = scalar_select %p289_p1, %s2400_s27, %s291_s15  }
   0xd   : > { %p2528_p5 = por %p302_p2, %p301_p0  ;;  %p2532_p6 = por %p308_p4, %p307_p3 }
   0xe   : > { %p2074_p7 = scmp.ge.s32.totalorder %s2404_s28, 1  ;;  %p392_p8 = scmp.lt.s32.totalorder %s2404_s28, 3 }
  0x10   : > { %p393_p9 = pnand %p2074_p7, %p392_p8 }
  0x11   : > { %p440_p10 = scmp.lt.s32.totalorder (!%p393_p9), %s2511_s29, 1  ;;  %vm453_vm0 = vcmask (!%p393_p9), 261120   ;;  %s2915_s0 = sld [smem:[#allocation5_spill]] (!%p393_p9)  ;;  %v2306_v7 = vld [vmem:[%s2899_s3] sm:$0xff] (!%p393_p9)   ;;  %v2406_v8 = vmov (!%p393_p9), 0.0   ;;  %vm2407_vm1 = vmmov (!%p393_p9), 0   ;;  %v553_v30 = vlaneseq (!%p393_p9) }
  0x12   : > { %396 = sbr.rel (%p393_p9) target bundleno = 2616 (0xa38), region = 68  ;;  %2162 = vmatprep.subr.bf16.mxu0 (!%p393_p9), %v2406_v8  ;;  %2166 = vmatprep.mubr.msk.bf16.mxu0 (!%p393_p9), %vm2407_vm1, %v2406_v8  ;;  %v2307_v9 = vld [vmem:[%s2899_s3 + $0x8] sm:$0xff] (!%p393_p9)   ;;  %s2916_s1 = sld [smem:[#allocation6_spill]] (!%p393_p9)  ;;  %v2413_v28 = vmov (!%p393_p9), 1983009808   ;;  %v2415_v55 = vmov (!%p393_p9), 0  }
  0x13   : > { %2163 = vmatpush3.bf16.msra.mxu0 (!%p393_p9), %v2306_v7  ;;  %2182 = vmatprep.subr.bf16.mxu1 (!%p393_p9), %v2406_v8  ;;  %s2917_s2 = sld [smem:[#allocation7_spill]] (!%p393_p9)  ;;  %s2408_s15 = smov (!%p393_p9), 104   ;;  %v551_v29 = vunpack.c.l.s4 (!%p393_p9), %v2413_v28  ;;  %v554_v32 = vshrl.u32 (!%p393_p9), %v553_v30, 7  ;;  %v2414_v33 = vmov (!%p393_p9), 1934713408   ;;  %vm1051_vm2 = vcmask (!%p393_p9), 64512  }
  0x14   : > { %2164 = vmatprep.subr.bf16.mxu0 (!%p393_p9), %v2406_v8  ;;  %2184 = vmatprep.mubr.msk.bf16.mxu1 (!%p393_p9), %vm2407_vm1, %v2406_v8  ;;  %s2409_s16 = smov (!%p393_p9), 120   ;;  %s2411_s22 = smov (!%p393_p9), 96   ;;  %v568_v34 = vunpack.c.l.s4 (!%p393_p9), %v2414_v33  ;;  %vm1320_vm3 = vcmask (!%p393_p9), 1043456   ;;  %vm1308_vm4 = vcmask (!%p393_p9), 59392   ;;  %vm1677_vm5 = vcmask (!%p393_p9), 130048  }
  0x15   : > { %s2412_s23 = smov (!%p393_p9), 64   ;;  %v552_v31 = vunpack.c.0.s8 (!%p393_p9), %v551_v29  ;;  %s2417_s30 = smov (!%p393_p9), 16   ;;  %vm1680_vm6 = vcmask (!%p393_p9), 195584  }
  0x16   : > { %v569_v38 = vunpack.c.0.s8 (!%p393_p9), %v568_v34 }
  0x17   : > { %2165 = vmatpush3.bf16.msra.mxu0 (!%p393_p9), %v2307_v9  ;;  %v2585_v35 = vsub.s32 (!%p393_p9), %v552_v31, %v554_v32 }
  0x18   : > { %2170 = vmatprep.subr.bf16.mxu0 (!%p393_p9), %v2406_v8  ;;  %v2079_v14 = vld [vmem:[%s2916_s1] ss:$0 sm:$0xff] (!%p393_p9)  ;;  %v2594_v44 = vsub.s32 (!%p393_p9), %v569_v38, %v554_v32 }
  0x19   : > { %s2540_s20 = scalar_select %p440_p10, %s2511_s29, 1  ;;  %v2080_v16 = vld [vmem:[%s2917_s2] ss:$0 sm:$0xff] }
  0x1b   : > { %s2076_s21 = sshll.u32 %s2540_s20, 3 }
  0x1c   : > { %s443_s24 = scalar_lea.vmem %s2915_s0, %s2076_s21  ;;  %s2410_s21 = smov 112  }
  0x1d   : > { %v2546_v0 = vld [vmem:[%s443_s24] sm:$0xff]  ;;  %s2123_s24 = sshll.u32 %s2540_s20, 4 }
  0x1e   : > { %v454_v1 = vsel %vm453_vm0, %v2546_v0, 0.0 }
  0x1f   : > { %455 = vadd.xlane.f32.xlu0 %v454_v1 }
  0xac   : > { %v456_v2 = vpop.xlane.xlu0 %455 }
  0xad   : > { %v458_v3 = vmul.f32 0.03125, %v456_v2 }
  0xaf   : > { %v459_v4 = vsub.f32 %v2546_v0, %v458_v3 }
  0xb1   : > { %v460_v5 = vmul.f32 %v459_v4, %v459_v4 }
  0xb3   : > { %v461_v6 = vsel %vm453_vm0, %v460_v5, 0.0 }
  0xb4   : > { %462 = vadd.xlane.f32.xlu0 %v461_v6 }
 0x141   : > { %v463_v10 = vpop.xlane.xlu0 %462 }
 0x142   : > { %v464_v11 = vmul.f32 0.03125, %v463_v10 }
 0x144   : > { %v465_v12 = vadd.f32 1e-05, %v464_v11 }
 0x146   : > { %2320 = vrsqrt.f32 %v465_v12 }
 0x150   : > { %v2321_v13 = vpop.eup %2320 }
 0x151   : > { %v467_v15 = vmul.f32 %v2321_v13, %v459_v4 }
 0x153   : > { %v474_v17 = vmul.f32 %v2079_v14, %v467_v15 }
 0x155   : > { %v481_v18 = vadd.f32 %v2080_v16, %v474_v17 }
 0x157   : > { %v482_v19 = vpack.c.bf16 %v481_v18, %v481_v18 }
 0x159   : > { %2167 = vmatmul.mubr.msk.bf16.vlgmr.msra.gmra.mrb[0].mxu0 %vm453_vm0, %v482_v19 }
 0x15a   : > { %2172 = vmatprep.mubr.msk.bf16.mxu0 %vm2407_vm1, %v2406_v8 }
 0x22c   : > { %v536_v20 = vpop.f32.mrb[0].mxu0 }
 0x22d   : > { %v542_v21 = vpack.c.bf16 %v536_v20, %v536_v20  ;;  %v2168_v22 = vpop.f32.mrb[1].mxu0 }
 0x22e   : > { %v539_v23 = vpop.f32.mrb[2].mxu0 }
 0x22f   : > { %548 = vrot.lane.b32.xlu0 %v542_v21, %s2408_s15  ;;  %544 = vrot.lane.b32.xlu1 %v542_v21, %s2409_s16  ;;  %v2169_v24 = vpop.f32.mrb[3].mxu0  ;;  %v556_v41 = vrot.slane %v542_v21, %v2585_v35  ;;  %s448_s16 = scalar_lea.vmem %s2909_s13, %s2123_s24  ;;  %s2416_s24 = smov 8  }
 0x230   : > { %s2418_s15 = smov 24  }
 0x233   : > { %546 = vrot.lane.b32.xlu1 %v542_v21, %s2410_s21 }
 0x237   : > { %711 = vrot.lane.b32.xlu1 %v542_v21, %s2411_s22 }
 0x2a1   : > { %v2575_v25 = vpop.permute.xlu1 %544  ;;  %v2581_v27 = vpop.permute.xlu0 %548 }
 0x2a2   : > { %713 = vrot.lane.b32.xlu1 %v2575_v25, %s2411_s22  ;;  %v598_v37 = vrot.slane %v2581_v27, %v2585_v35  ;;  %v590_v39 = vrot.slane %v2575_v25, %v2585_v35 }
 0x2a4   : > { %v599_v45 = vcombine.low %v590_v39, %v598_v37  ;;  %v600_v47 = vcombine.high %v590_v39, %v598_v37 }
 0x2a5   : > { %v2578_v26 = vpop.permute.xlu1 %546 }
 0x2a6   : > { %715 = vrot.lane.b32.xlu1 %v2578_v26, %s2411_s22  ;;  %v564_v36 = vrot.slane %v2578_v26, %v2585_v35  ;;  %v2603_v50 = vrot.slane %v599_v45, %v2594_v44  ;;  %v2606_v52 = vrot.slane %v600_v47, %v2594_v44 }
 0x2a8   : > { %v565_v42 = vcombine.low %v556_v41, %v564_v36  ;;  %v566_v43 = vcombine.high %v556_v41, %v564_v36  ;;  %v615_v60 = vcombine.high %v2603_v50, %v2415_v55  ;;  %v616_v62 = vcombine.high %v2606_v52, %v2415_v55 }
 0x2a9   : > { %v712_v40 = vpop.permute.xlu1 %711  ;;  %v622_v5 = vshrl.u32 %v2603_v50, 16  ;;  %v638_v11 = vshrl.u32 %v2606_v52, 16 }
 0x2aa   : > { %717 = vrot.lane.b32.xlu1 %v2581_v27, %s2411_s22  ;;  %v2597_v48 = vrot.slane %v565_v42, %v2594_v44  ;;  %v2600_v49 = vrot.slane %v566_v43, %v2594_v44  ;;  %v726_v53 = vrot.slane %v712_v40, %v2585_v35  ;;  %v630_v10 = vshrl.u32 %v615_v60, 16 }
 0x2ab   : > { %v646_v14 = vshrl.u32 %v616_v62, 16 }
 0x2ac   : > { %v581_v56 = vcombine.high %v2597_v48, %v2415_v55  ;;  %v582_v57 = vcombine.high %v2600_v49, %v2415_v55  ;;  %v621_v63 = vshrl.u32 %v2597_v48, 16  ;;  %v637_v3 = vshrl.u32 %v2600_v49, 16 }
 0x2ad   : > { %v619_v47 = vpack.i.b16 %v2603_v50, %v2597_v48 }
 0x2ae   : > { %881 = vrot.lane.b32.xlu1 %v542_v21, %s2412_s23  ;;  %v629_v6 = vshrl.u32 %v581_v56, 16  ;;  %v645_v7 = vshrl.u32 %v582_v57, 16  ;;  %v623_v15 = vpack.i.b16 %v622_v5, %v621_v63  ;;  %v627_v16 = vpack.i.b16 %v615_v60, %v581_v56 }
 0x2af   : > { %v639_v18 = vpack.i.b16 %v638_v11, %v637_v3  ;;  %v643_v19 = vpack.i.b16 %v616_v62, %v582_v57 }
 0x2b0   : > { %v631_v22 = vpack.i.b16 %v630_v10, %v629_v6  ;;  %v647_v23 = vpack.i.b16 %v646_v14, %v645_v7 }
 0x2b1   : > { %v674_v62 = vcombine.low %v623_v15, %v639_v18 }
 0x2b2   : > { %v682_v56 = vcombine.low %v631_v22, %v647_v23 }
 0x2b4   : > { %v689_v3 = vrot.slane %v682_v56, %v2585_v35 }
 0x314   : > { %v714_v46 = vpop.permute.xlu1 %713 }
 0x315   : > { %v760_v4 = vrot.slane %v714_v46, %v2585_v35 }
 0x318   : > { %v716_v51 = vpop.permute.xlu1 %715 }
 0x319   : > { %v734_v54 = vrot.slane %v716_v51, %v2585_v35 }
 0x31b   : > { %v735_v58 = vcombine.low %v726_v53, %v734_v54  ;;  %v736_v59 = vcombine.high %v726_v53, %v734_v54  ;;  %v635_v54 = vpack.i.b16 %v2606_v52, %v2600_v49  ;;  %v681_v52 = vrot.slane %v674_v62, %v2585_v35 }
 0x31c   : > { %v718_v61 = vpop.permute.xlu1 %717 }
 0x31d   : > { %v743_v1 = vrot.slane %v735_v58, %v2594_v44  ;;  %v768_v2 = vrot.slane %v718_v61, %v2585_v35  ;;  %v750_v9 = vrot.slane %v736_v59, %v2594_v44  ;;  %v657_v61 = vcombine.low %v627_v16, %v643_v19 }
 0x31f   : > { %v769_v12 = vcombine.low %v760_v4, %v768_v2  ;;  %v770_v13 = vcombine.high %v760_v4, %v768_v2  ;;  %v751_v17 = vcombine.high %v743_v1, %v2415_v55  ;;  %v752_v24 = vcombine.high %v750_v9, %v2415_v55 }
 0x320   : > { %v791_v28 = vshrl.u32 %v743_v1, 16  ;;  %v807_v34 = vshrl.u32 %v750_v9, 16  ;;  %v649_v2 = vcombine.low %v619_v47, %v635_v54  ;;  %v664_v49 = vrot.slane %v657_v61, %v2585_v35 }
 0x321   : > { %v777_v20 = vrot.slane %v769_v12, %v2594_v44  ;;  %v784_v21 = vrot.slane %v770_v13, %v2594_v44  ;;  %v799_v33 = vshrl.u32 %v751_v17, 16  ;;  %v815_v42 = vshrl.u32 %v752_v24, 16 }
 0x322   : > { %v656_v6 = vrot.slane %v649_v2, %v2585_v35 }
 0x323   : > { %v785_v29 = vcombine.high %v777_v20, %v2415_v55  ;;  %v786_v30 = vcombine.high %v784_v21, %v2415_v55  ;;  %v789_v31 = vpack.i.b16 %v777_v20, %v743_v1  ;;  %v792_v32 = vshrl.u32 %v777_v20, 16 }
 0x324   : > { %v805_v36 = vpack.i.b16 %v784_v21, %v750_v9  ;;  %v808_v37 = vshrl.u32 %v784_v21, 16  ;;  %v690_v9 = vcombine.low %v681_v52, %v689_v3  ;;  %v665_v10 = vcombine.low %v656_v6, %v664_v49 }
 0x325   : > { %v793_v38 = vpack.i.b16 %v792_v32, %v791_v28  ;;  %v797_v39 = vpack.i.b16 %v785_v29, %v751_v17  ;;  %v800_v40 = vshrl.u32 %v785_v29, 16  ;;  %v813_v41 = vpack.i.b16 %v786_v30, %v752_v24 }
 0x326   : > { %v809_v43 = vpack.i.b16 %v808_v37, %v807_v34  ;;  %v816_v45 = vshrl.u32 %v786_v30, 16  ;;  %v819_v46 = vcombine.low %v789_v31, %v805_v36  ;;  %v697_v16 = vrot.slane %v690_v9, %v2594_v44 }
 0x327   : > { %v801_v51 = vpack.i.b16 %v800_v40, %v799_v33  ;;  %v827_v53 = vcombine.low %v797_v39, %v813_v41  ;;  %v672_v19 = vrot.slane %v665_v10, %v2594_v44 }
 0x328   : > { %v817_v57 = vpack.i.b16 %v816_v45, %v815_v42  ;;  %v844_v58 = vcombine.low %v793_v38, %v809_v43  ;;  %v826_v59 = vrot.slane %v819_v46, %v2585_v35  ;;  %v698_v22 = vcombine.high %v697_v16, %v2415_v55 }
 0x329   : > { %v834_v60 = vrot.slane %v827_v53, %v2585_v35  ;;  %v701_v23 = vpack.i.b16 %v697_v16, %v672_v19  ;;  %v673_v24 = vcombine.high %v672_v19, %v2415_v55  ;;  %v703_v32 = vshrl.u32 %v697_v16, 16 }
 0x32a   : > { %v852_v63 = vcombine.low %v801_v51, %v817_v57  ;;  %v851_v48 = vrot.slane %v844_v58, %v2585_v35  ;;  %v702_v33 = vshrl.u32 %v672_v19, 16  ;;  %v709_v38 = vshrl.u32 %v698_v22, 16 }
 0x32b   : > { %v835_v1 = vcombine.low %v826_v59, %v834_v60  ;;  %v707_v30 = vpack.i.b16 %v698_v22, %v673_v24  ;;  %v708_v39 = vshrl.u32 %v673_v24, 16 }
 0x32c   : > { %v859_v50 = vrot.slane %v852_v63, %v2585_v35  ;;  %v704_v36 = vpack.i.b16 %v703_v32, %v702_v33 }
 0x32d   : > { %v842_v4 = vrot.slane %v835_v1, %v2594_v44  ;;  %v710_v40 = vpack.i.b16 %v709_v38, %v708_v39 }
 0x32e   : > { %v860_v5 = vcombine.low %v851_v48, %v859_v50  ;;  %v882_v48 = vpop.permute.xlu1 %881 }
 0x32f   : > { %v843_v12 = vcombine.high %v842_v4, %v2415_v55  ;;  %v872_v20 = vshrl.u32 %v842_v4, 16 }
 0x330   : > { %v867_v7 = vrot.slane %v860_v5, %v2594_v44 }
 0x331   : > { %v878_v31 = vshrl.u32 %v843_v12, 16 }
 0x332   : > { %v871_v11 = vpack.i.b16 %v867_v7, %v842_v4  ;;  %v868_v13 = vcombine.high %v867_v7, %v2415_v55  ;;  %v873_v17 = vshrl.u32 %v867_v7, 16 }
 0x334   : > { %v1056_v14 = vsel %vm1051_vm2, %v871_v11, 0  ;;  %v877_v15 = vpack.i.b16 %v868_v13, %v843_v12  ;;  %v874_v21 = vpack.i.b16 %v873_v17, %v872_v20  ;;  %v879_v28 = vshrl.u32 %v868_v13, 16 }
 0x335   : > { %2171 = vmatpush3.bf16.xpose.msra.mxu0 %v1056_v14 }
 0x336   : > { %v1148_v18 = vsel %vm1051_vm2, %v877_v15, 0  ;;  %2176 = vmatprep.subr.bf16.mxu0 %v2406_v8  ;;  %v1102_v29 = vsel %vm1051_vm2, %v874_v21, 0  ;;  %v880_v34 = vpack.i.b16 %v879_v28, %v878_v31 }
 0x337   : > { %2183 = vmatpush3.bf16.xpose.msra.mxu1 %v1148_v18 }
 0x338   : > { %2194 = vmatprep.subr.bf16.mxu1 %v2406_v8  ;;  %v1194_v37 = vsel %vm1051_vm2, %v880_v34, 0 }
 0x33c   : > { %2173 = vmatmul.mubr.msk.bf16.vlgmr.msra.gmra.mrb[4].mxu0 %vm1051_vm2, %v701_v23 }
 0x33d   : > { %2177 = vmatpush3.bf16.xpose.msra.mxu0 %v1102_v29  ;;  %2178 = vmatprep.mubr.msk.bf16.mxu0 %vm2407_vm1, %v2406_v8 }
 0x33e   : > { %2185 = vmatmul.mubr.msk.bf16.vlgmr.msra.gmra.mrb[0].mxu1 %vm1051_vm2, %v707_v30  ;;  %2188 = vmatprep.subr.bf16.mxu0 %v2406_v8 }
 0x33f   : > { %2196 = vmatprep.mubr.msk.bf16.mxu1 %vm2407_vm1, %v2406_v8 }
 0x344   : > { %2179 = vmatmul.mubr.msk.bf16.vlgmr.msra.gmra.mrb[8].mxu0 %vm1051_vm2, %v704_v36 }
 0x345   : > { %2189 = vmatpush3.bf16.xpose.msra.mxu0 %v1194_v37  ;;  %2190 = vmatprep.mubr.msk.bf16.mxu0 %vm2407_vm1, %v2406_v8 }
 0x346   : > { %2200 = vmatprep.subr.bf16.mxu0 %v2406_v8 }
 0x34c   : > { %2191 = vmatmul.mubr.msk.bf16.vlgmr.msra.gmra.mrb[12].mxu0 %vm1051_vm2, %v710_v40 }
 0x34d   : > { %2202 = vmatprep.mubr.msk.bf16.mxu0 %vm2407_vm1, %v2406_v8 }
 0x40f   : > { %v1092_v41 = vpop.f32.mrb[4].mxu0 }
 0x410   : > { %v2174_v42 = vpop.f32.mrb[5].mxu0  ;;  %v1236_v43 = vsel %vm1051_vm2, %v1092_v41, -inf }
 0x411   : > { %v2673_v45 = vpop.f32.mrb[0].mxu1  ;;  %1237 = vmax.xlane.f32.xlu1 %v1236_v43  ;;  %v1095_v46 = vpop.f32.mrb[6].mxu0 }
 0x412   : > { %v2175_v47 = vpop.f32.mrb[7].mxu0  ;;  %v2186_v51 = vpop.f32.mrb[1].mxu1  ;;  %v1242_v3 = vsel %vm1051_vm2, %v2673_v45, -inf }
 0x413   : > { %v1187_v53 = vpop.f32.mrb[2].mxu1 }
 0x414   : > { %v2187_v54 = vpop.f32.mrb[3].mxu1 }
 0x417   : > { %v1138_v56 = vpop.f32.mrb[8].mxu0 }
 0x418   : > { %v2180_v57 = vpop.f32.mrb[9].mxu0  ;;  %v1239_v58 = vsel %vm1051_vm2, %v1138_v56, -inf }
 0x419   : > { %1240 = vmax.xlane.f32.xlu0 %v1239_v58  ;;  %v1141_v59 = vpop.f32.mrb[10].mxu0 }
 0x41a   : > { %v2181_v60 = vpop.f32.mrb[11].mxu0 }
 0x41f   : > { %v2676_v61 = vpop.f32.mrb[12].mxu0 }
 0x420   : > { %v2192_v62 = vpop.f32.mrb[13].mxu0  ;;  %v1245_v2 = vsel %vm1051_vm2, %v2676_v61, -inf }
 0x421   : > { %v1233_v63 = vpop.f32.mrb[14].mxu0 }
 0x422   : > { %885 = vrot.lane.b32.xlu1 %v2578_v26, %s2412_s23  ;;  %v2193_v1 = vpop.f32.mrb[15].mxu0 }
 0x426   : > { %887 = vrot.lane.b32.xlu1 %v2581_v27, %s2412_s23  ;;  %v896_v27 = vrot.slane %v882_v48, %v2585_v35 }
 0x42f   : > { %883 = vrot.lane.b32.xlu0 %v2575_v25, %s2412_s23  ;;  %s430_s23 = sand.u32 1, %s2396_s26  }
 0x44a   : > { %1246 = vmax.xlane.f32.xlu1 %v1245_v2 }
 0x44e   : > { %1243 = vmax.xlane.f32.xlu0 %v1242_v3 }
 0x49e   : > { %v1238_v50 = vpop.xlane.xlu1 %1237 }
 0x49f   : > { %v1248_v49 = vsub.f32 %v1092_v41, %v1238_v50 }
 0x4a1   : > { %v1252_v52 = vmul.f32 1.442695, %v1248_v49 }
 0x4a2   : > { %v886_v26 = vpop.permute.xlu1 %885 }
 0x4a3   : > { %2322 = vpow2.f32 %v1252_v52  ;;  %v904_v4 = vrot.slane %v886_v26, %v2585_v35 }
 0x4a5   : > { %v905_v5 = vcombine.low %v896_v27, %v904_v4  ;;  %v906_v7 = vcombine.high %v896_v27, %v904_v4 }
 0x4a6   : > { %v1241_v25 = vpop.xlane.xlu0 %1240  ;;  %v888_v9 = vpop.permute.xlu1 %887 }
 0x4a7   : > { %v1249_v6 = vsub.f32 %v1138_v56, %v1241_v25  ;;  %v913_v10 = vrot.slane %v905_v5, %v2594_v44  ;;  %v938_v13 = vrot.slane %v888_v9, %v2585_v35  ;;  %v920_v15 = vrot.slane %v906_v7, %v2594_v44 }
 0x4a9   : > { %v1254_v11 = vmul.f32 1.442695, %v1249_v6  ;;  %v921_v19 = vcombine.high %v913_v10, %v2415_v55  ;;  %v922_v23 = vcombine.high %v920_v15, %v2415_v55  ;;  %v961_v24 = vshrl.u32 %v913_v10, 16 }
 0x4aa   : > { %v884_v12 = vpop.permute.xlu0 %883  ;;  %v977_v33 = vshrl.u32 %v920_v15, 16 }
 0x4ab   : > { %v930_v14 = vrot.slane %v884_v12, %v2585_v35  ;;  %2324 = vpow2.f32 %v1254_v11  ;;  %v969_v32 = vshrl.u32 %v921_v19, 16  ;;  %v985_v41 = vshrl.u32 %v922_v23, 16 }
 0x4ad   : > { %v2694_v16 = vpop.eup %2322  ;;  %v939_v17 = vcombine.low %v930_v14, %v938_v13  ;;  %v940_v18 = vcombine.high %v930_v14, %v938_v13 }
 0x4ae   : > { %v1260_v20 = vsel %vm1051_vm2, %v2694_v16, 0.0 }
 0x4af   : > { %v947_v21 = vrot.slane %v939_v17, %v2594_v44  ;;  %v954_v22 = vrot.slane %v940_v18, %v2594_v44  ;;  %1261 = vadd.xlane.f32.xlu0 %v1260_v20 }
 0x4b1   : > { %v955_v28 = vcombine.high %v947_v21, %v2415_v55  ;;  %v956_v29 = vcombine.high %v954_v22, %v2415_v55  ;;  %v959_v30 = vpack.i.b16 %v947_v21, %v913_v10  ;;  %v962_v31 = vshrl.u32 %v947_v21, 16 }
 0x4b2   : > { %v975_v34 = vpack.i.b16 %v954_v22, %v920_v15  ;;  %v978_v36 = vshrl.u32 %v954_v22, 16  ;;  %v1313_v10 = vpack.c.bf16 %v2694_v16, %v2694_v16 }
 0x4b3   : > { %v963_v37 = vpack.i.b16 %v962_v31, %v961_v24  ;;  %v967_v38 = vpack.i.b16 %v955_v28, %v921_v19  ;;  %v970_v39 = vshrl.u32 %v955_v28, 16  ;;  %v983_v40 = vpack.i.b16 %v956_v29, %v922_v23 }
 0x4b4   : > { %v979_v42 = vpack.i.b16 %v978_v36, %v977_v33  ;;  %v986_v43 = vshrl.u32 %v956_v29, 16  ;;  %v989_v46 = vcombine.low %v959_v30, %v975_v34 }
 0x4b5   : > { %v971_v47 = vpack.i.b16 %v970_v39, %v969_v32  ;;  %v997_v51 = vcombine.low %v967_v38, %v983_v40  ;;  %v2704_v53 = vpop.eup %2324 }
 0x4b6   : > { %v987_v54 = vpack.i.b16 %v986_v43, %v985_v41  ;;  %v1014_v56 = vcombine.low %v963_v37, %v979_v42  ;;  %v996_v57 = vrot.slane %v989_v46, %v2585_v35  ;;  %v1263_v58 = vsel %vm1051_vm2, %v2704_v53, 0.0 }
 0x4b7   : > { %v1004_v59 = vrot.slane %v997_v51, %v2585_v35  ;;  %1264 = vadd.xlane.f32.xlu0 %v1263_v58  ;;  %v1314_v13 = vpack.c.bf16 %v2704_v53, %v2704_v53 }
 0x4b8   : > { %v1022_v60 = vcombine.low %v971_v47, %v987_v54  ;;  %v1021_v63 = vrot.slane %v1014_v56, %v2585_v35 }
 0x4b9   : > { %v1005_v62 = vcombine.low %v996_v57, %v1004_v59 }
 0x4ba   : > { %v1029_v1 = vrot.slane %v1022_v60, %v2585_v35 }
 0x4bb   : > { %v1012_v2 = vrot.slane %v1005_v62, %v2594_v44 }
 0x4bc   : > { %v1030_v3 = vcombine.low %v1021_v63, %v1029_v1 }
 0x4bd   : > { %v1013_v48 = vcombine.high %v1012_v2, %v2415_v55  ;;  %v1042_v52 = vshrl.u32 %v1012_v2, 16 }
 0x4be   : > { %v1037_v50 = vrot.slane %v1030_v3, %v2594_v44 }
 0x4bf   : > { %v1048_v27 = vshrl.u32 %v1013_v48, 16 }
 0x4c0   : > { %v1041_v49 = vpack.i.b16 %v1037_v50, %v1012_v2  ;;  %v1043_v26 = vshrl.u32 %v1037_v50, 16  ;;  %v1038_v4 = vcombine.high %v1037_v50, %v2415_v55 }
 0x4c2   : > { %v1322_v5 = vsel %vm1320_vm3, %v1041_v49, 0  ;;  %v1044_v25 = vpack.i.b16 %v1043_v26, %v1042_v52  ;;  %v1047_v6 = vpack.i.b16 %v1038_v4, %v1013_v48  ;;  %v1049_v7 = vshrl.u32 %v1038_v4, 16 }
 0x4c3   : > { %2195 = vmatpush3.bf16.msra.mxu1 %v1322_v5 }
 0x4c4   : > { %v1368_v9 = vsel %vm1320_vm3, %v1044_v25, 0  ;;  %2206 = vmatprep.subr.bf16.mxu1 %v2406_v8  ;;  %v1050_v11 = vpack.i.b16 %v1049_v7, %v1048_v27  ;;  %v1414_v12 = vsel %vm1320_vm3, %v1047_v6, 0 }
 0x4c5   : > { %2201 = vmatpush3.bf16.msra.mxu0 %v1368_v9 }
 0x4c6   : > { %2197 = vmatmul.mubr.msk.bf16.vlgmr.msra.gmra.mrb[4].mxu1 %vm1051_vm2, %v1313_v10  ;;  %2212 = vmatprep.subr.bf16.mxu0 %v2406_v8  ;;  %v1460_v14 = vsel %vm1320_vm3, %v1050_v11, 0 }
 0x4c7   : > { %2207 = vmatpush3.bf16.msra.mxu1 %v1414_v12  ;;  %2208 = vmatprep.mubr.msk.bf16.mxu1 %vm2407_vm1, %v2406_v8 }
 0x4c8   : > { %2203 = vmatmul.mubr.msk.bf16.vlgmr.msra.gmra.mrb[16].mxu0 %vm1051_vm2, %v1314_v13  ;;  %2218 = vmatprep.subr.bf16.mxu1 %v2406_v8 }
 0x4c9   : > { %2213 = vmatpush3.bf16.msra.mxu0 %v1460_v14  ;;  %2214 = vmatprep.mubr.msk.bf16.mxu0 %vm2407_vm1, %v2406_v8 }
 0x4ca   : > { %2226 = vmatprep.subr.bf16.mxu0 %v2406_v8 }
 0x4d7   : > { %v1247_v15 = vpop.xlane.xlu1 %1246 }
 0x4d8   : > { %v1251_v17 = vsub.f32 %v2676_v61, %v1247_v15 }
 0x4da   : > { %v1258_v18 = vmul.f32 1.442695, %v1251_v17 }
 0x4db   : > { %v1244_v19 = vpop.xlane.xlu0 %1243 }
 0x4dc   : > { %2326 = vpow2.f32 %v1258_v18  ;;  %v1250_v20 = vsub.f32 %v2673_v45, %v1244_v19 }
 0x4de   : > { %v1256_v21 = vmul.f32 1.442695, %v1250_v20 }
 0x4e0   : > { %2328 = vpow2.f32 %v1256_v21 }
 0x4e6   : > { %v2327_v22 = vpop.eup %2326 }
 0x4e7   : > { %v1269_v23 = vsel %vm1051_vm2, %v2327_v22, 0.0  ;;  %v1316_v24 = vpack.c.bf16 %v2327_v22, %v2327_v22 }
 0x4e8   : > { %1270 = vadd.xlane.f32.xlu0 %v1269_v23 }
 0x4e9   : > { %2215 = vmatmul.mubr.msk.bf16.vlgmr.msra.gmra.mrb[20].mxu0 %vm1051_vm2, %v1316_v24 }
 0x4ea   : > { %v2329_v28 = vpop.eup %2328  ;;  %2230 = vmatprep.mubr.msk.bf16.mxu0 %vm2407_vm1, %v2406_v8 }
 0x4eb   : > { %v1266_v61 = vsel %vm1051_vm2, %v2329_v28, 0.0  ;;  %v1315_v29 = vpack.c.bf16 %v2329_v28, %v2329_v28 }
 0x4ec   : > { %1267 = vadd.xlane.f32.xlu1 %v1266_v61 }
 0x4ed   : > { %2209 = vmatmul.mubr.msk.bf16.vlgmr.msra.gmra.mrb[8].mxu1 %vm1051_vm2, %v1315_v29 }
 0x4ee   : > { %2222 = vmatprep.mubr.msk.bf16.mxu1 %vm2407_vm1, %v2406_v8 }
 0x53c   : > { %v1262_v45 = vpop.xlane.xlu0 %1261 }
 0x53d   : > { %2330 = vrcp.f32 %v1262_v45 }
 0x544   : > { %v1265_v30 = vpop.xlane.xlu0 %1264 }
 0x545   : > { %2332 = vrcp.f32 %v1265_v30 }
 0x547   : > { %v2331_v31 = vpop.eup %2330 }
 0x548   : > { %v1276_v32 = vmul.f32 %v2331_v31, %v2694_v16  ;;  %v2308_v16 = vld [vmem:[%s2900_s4] sm:$0xff]  }
 0x549   : > { %2219 = vmatpush3.bf16.msra.mxu1 %v2308_v16 }
 0x54a   : > { %v2124_v33 = vpack.c.bf16 %v1276_v32, %v1276_v32  ;;  %2220 = vmatprep.subr.bf16.mxu1 %v2406_v8 }
 0x54c   : > { %v2092_v34 = vrot.slane %v2124_v33, 9 }
 0x54e   : > { %1309 = vst.msk [vmem:[%s448_s16] sm:$0x7] %vm1308_vm4, %v2092_v34 }
 0x54f   : > { %v2333_v36 = vpop.eup %2332 }
 0x550   : > { %v1277_v37 = vmul.f32 %v2333_v36, %v2704_v53 }
 0x552   : > { %v2125_v38 = vpack.c.bf16 %v1277_v37, %v1277_v37 }
 0x554   : > { %v2093_v39 = vrot.slane %v2125_v38, 9 }
 0x556   : > { %1310 = vst.msk [vmem:[%s448_s16 + $0x4] sm:$0x7] %vm1308_vm4, %v2093_v39 }
 0x575   : > { %v1271_v40 = vpop.xlane.xlu0 %1270 }
 0x576   : > { %2334 = vrcp.f32 %v1271_v40 }
 0x579   : > { %v1268_v41 = vpop.xlane.xlu1 %1267 }
 0x57a   : > { %2336 = vrcp.f32 %v1268_v41 }
 0x580   : > { %v2335_v42 = vpop.eup %2334 }
 0x581   : > { %v1279_v43 = vmul.f32 %v2335_v42, %v2327_v22 }
 0x583   : > { %v2127_v46 = vpack.c.bf16 %v1279_v43, %v1279_v43 }
 0x584   : > { %v2337_v47 = vpop.eup %2336 }
 0x585   : > { %v2095_v51 = vrot.slane %v2127_v46, 9  ;;  %v1278_v53 = vmul.f32 %v2337_v47, %v2329_v28 }
 0x587   : > { %1312 = vst.msk [vmem:[%s448_s16 + $0xc] sm:$0x7] %vm1308_vm4, %v2095_v51  ;;  %v2126_v54 = vpack.c.bf16 %v1278_v53, %v1278_v53 }
 0x589   : > { %v2094_v56 = vrot.slane %v2126_v54, 9 }
 0x58b   : > { %1311 = vst.msk [vmem:[%s448_s16 + $0x8] sm:$0x7] %vm1308_vm4, %v2094_v56  ;;  %s2120_s16 = sshll.u32 %s2511_s29, 7  ;;  %s1966_s29 = scalar_lea.sflag [#allocation3], %s430_s23 }
 0x58c   : > { %s2853_s1 = scalar_lea.hbm %s2908_s12, %s2120_s16 }
 0x599   : > { %v1358_v57 = vpop.f32.mrb[4].mxu1 }
 0x59a   : > { %v2198_v58 = vpop.f32.mrb[5].mxu1  ;;  %v1502_v26 = vmul.f32 %v2331_v31, %v1358_v57 }
 0x59b   : > { %v1361_v59 = vpop.f32.mrb[6].mxu1  ;;  %v1404_v60 = vpop.f32.mrb[16].mxu0 }
 0x59c   : > { %v2199_v62 = vpop.f32.mrb[7].mxu1  ;;  %v2204_v63 = vpop.f32.mrb[17].mxu0  ;;  %v1503_v3 = vmul.f32 %v2333_v36, %v1404_v60  ;;  %v1506_v11 = vpack.c.bf16 %v1502_v26, %v1502_v26  ;;  %v2309_v59 = vld [vmem:[%s2900_s4 + $0x8] sm:$0xff]  }
 0x59d   : > { %v1407_v1 = vpop.f32.mrb[18].mxu0  ;;  %2221 = vmatpush3.bf16.msra.mxu1 %v2309_v59 }
 0x59e   : > { %v2205_v2 = vpop.f32.mrb[19].mxu0  ;;  %v1540_v50 = vpack.c.bf16 %v1503_v3, %v1503_v3  ;;  %v1513_v20 = vrot.slane %v1506_v11, %v2585_v35  ;;  %2234 = vmatprep.subr.bf16.mxu1 %v2406_v8 }
 0x5a0   : > { %v1547_v6 = vrot.slane %v1540_v50, %v2585_v35 }
 0x5bc   : > { %v1496_v48 = vpop.f32.mrb[20].mxu0 }
 0x5bd   : > { %v1505_v49 = vmul.f32 %v2335_v42, %v1496_v48  ;;  %v2216_v52 = vpop.f32.mrb[21].mxu0 }
 0x5be   : > { %v1499_v4 = vpop.f32.mrb[22].mxu0 }
 0x5bf   : > { %v1548_v27 = vpack.c.bf16 %v1505_v49, %v1505_v49  ;;  %v2217_v5 = vpop.f32.mrb[23].mxu0 }
 0x5c0   : > { %v1450_v25 = vpop.f32.mrb[8].mxu1 }
 0x5c1   : > { %v1555_v7 = vrot.slane %v1548_v27, %v2585_v35  ;;  %v1504_v9 = vmul.f32 %v2337_v47, %v1450_v25  ;;  %v2210_v10 = vpop.f32.mrb[9].mxu1 }
 0x5c2   : > { %v1453_v12 = vpop.f32.mrb[10].mxu1 }
 0x5c3   : > { %v1556_v13 = vcombine.low %v1547_v6, %v1555_v7  ;;  %v1557_v14 = vcombine.high %v1547_v6, %v1555_v7  ;;  %v1514_v15 = vpack.c.bf16 %v1504_v9, %v1504_v9  ;;  %v2211_v17 = vpop.f32.mrb[11].mxu1 }
 0x5c5   : > { %v1564_v18 = vrot.slane %v1556_v13, %v2594_v44  ;;  %v1521_v19 = vrot.slane %v1514_v15, %v2585_v35  ;;  %v1571_v21 = vrot.slane %v1557_v14, %v2594_v44  ;;  %v2103_v13 = vld [vmem:[%s2901_s5] ss:$0 sm:$0xff] }
 0x5c7   : > { %v1522_v22 = vcombine.low %v1513_v20, %v1521_v19  ;;  %v1523_v23 = vcombine.high %v1513_v20, %v1521_v19  ;;  %v1572_v24 = vcombine.high %v1564_v18, %v2415_v55  ;;  %v1573_v29 = vcombine.high %v1571_v21, %v2415_v55 }
 0x5c8   : > { %v1579_v45 = vshrl.u32 %v1564_v18, 16  ;;  %v1595_v36 = vshrl.u32 %v1571_v21, 16 }
 0x5c9   : > { %v1530_v28 = vrot.slane %v1522_v22, %v2594_v44  ;;  %v1537_v61 = vrot.slane %v1523_v23, %v2594_v44  ;;  %v1587_v34 = vshrl.u32 %v1572_v24, 16  ;;  %v1603_v42 = vshrl.u32 %v1573_v29, 16 }
 0x5cb   : > { %v1538_v30 = vcombine.high %v1530_v28, %v2415_v55  ;;  %v1539_v31 = vcombine.high %v1537_v61, %v2415_v55  ;;  %v1576_v32 = vpack.i.b16 %v1564_v18, %v1530_v28  ;;  %v1578_v33 = vshrl.u32 %v1530_v28, 16 }
 0x5cc   : > { %v1592_v37 = vpack.i.b16 %v1571_v21, %v1537_v61  ;;  %v1594_v38 = vshrl.u32 %v1537_v61, 16  ;;  %v2311_v61 = vld [vmem:[%s2904_s8 + $0x8] sm:$0xff]  }
 0x5cd   : > { %v1580_v39 = vpack.i.b16 %v1579_v45, %v1578_v33  ;;  %v1584_v16 = vpack.i.b16 %v1572_v24, %v1538_v30  ;;  %v1586_v40 = vshrl.u32 %v1538_v30, 16  ;;  %v1600_v41 = vpack.i.b16 %v1573_v29, %v1539_v31  ;;  %v2312_v29 = vld [vmem:[%s2906_s10] sm:$0xff]   ;;  %v2313_v45 = vld [vmem:[%s2906_s10 + $0x8] sm:$0xff]   ;;  %v2314_v30 = vld [vmem:[%s2906_s10 + $0x10] sm:$0xff]  }
 0x5ce   : > { %v1596_v43 = vpack.i.b16 %v1595_v36, %v1594_v38  ;;  %v1602_v46 = vshrl.u32 %v1539_v31, 16  ;;  %v1606_v47 = vcombine.low %v1576_v32, %v1592_v37  ;;  %v2104_v36 = vld [vmem:[%s2902_s6] ss:$0 sm:$0xff] }
 0x5cf   : > { %v1588_v51 = vpack.i.b16 %v1587_v34, %v1586_v40  ;;  %v1614_v53 = vcombine.low %v1584_v16, %v1600_v41  ;;  %v2105_v38 = vld [vmem:[%s2903_s7] ss:$0 sm:$0xff]  ;;  %v2315_v41 = vld [vmem:[%s2906_s10 + $0x18] sm:$0xff]  }
 0x5d0   : > { %v1604_v54 = vpack.i.b16 %v1603_v42, %v1602_v46  ;;  %v1631_v56 = vcombine.low %v1580_v39, %v1596_v43  ;;  %v1613_v57 = vrot.slane %v1606_v47, %v2585_v35  ;;  %v2316_v42 = vld [vmem:[%s2906_s10 + $0x20] sm:$0xff]   ;;  %v2317_v43 = vld [vmem:[%s2906_s10 + $0x28] sm:$0xff]   ;;  %v2318_v46 = vld [vmem:[%s2906_s10 + $0x30] sm:$0xff]  }
 0x5d1   : > { %v1621_v58 = vrot.slane %v1614_v53, %v2585_v35  ;;  %v2319_v47 = vld [vmem:[%s2906_s10 + $0x38] sm:$0xff]  }
 0x5d2   : > { %v1639_v60 = vcombine.low %v1588_v51, %v1604_v54  ;;  %v1638_v63 = vrot.slane %v1631_v56, %v2585_v35  ;;  %v2106_v51 = vld [vmem:[%s2905_s9] ss:$0 sm:$0xff] }
 0x5d3   : > { %v1622_v62 = vcombine.low %v1613_v57, %v1621_v58 }
 0x5d4   : > { %v1646_v1 = vrot.slane %v1639_v60, %v2585_v35 }
 0x5d5   : > { %v1629_v2 = vrot.slane %v1622_v62, %v2594_v44 }
 0x5d6   : > { %v1647_v3 = vcombine.low %v1638_v63, %v1646_v1 }
 0x5d7   : > { %v1630_v50 = vcombine.high %v1629_v2, %v2415_v55  ;;  %v1659_v49 = vshrl.u32 %v1629_v2, 16 }
 0x5d8   : > { %v1654_v48 = vrot.slane %v1647_v3, %v2594_v44 }
 0x5d9   : > { %v1665_v25 = vshrl.u32 %v1630_v50, 16 }
 0x5da   : > { %v1660_v52 = vshrl.u32 %v1654_v48, 16  ;;  %v1655_v26 = vcombine.high %v1654_v48, %v2415_v55  ;;  %v1658_v4 = vpack.i.b16 %v1654_v48, %v1629_v2  ;;  %v2110_v2 = vld [vmem:[%s2907_s11] ss:$0 sm:$0xff] }
 0x5dc   : > { %v1661_v27 = vpack.i.b16 %v1660_v52, %v1659_v49  ;;  %v1664_v5 = vpack.i.b16 %v1655_v26, %v1630_v50  ;;  %v1666_v6 = vshrl.u32 %v1655_v26, 16 }
 0x5de   : > { %1668 = vrot.lane.b32.xlu1 %v1661_v27, %s2416_s24  ;;  %1670 = vrot.lane.b32.xlu0 %v1664_v5, %s2417_s30  ;;  %v1667_v35 = vpack.i.b16 %v1666_v6, %v1665_v25  ;;  %s2075_s24 = sshll.u32 %s430_s23, 3  ;;  %s2419_s30 = smov [#allocation2]  }
 0x5df   : > { %s432_s21 = scalar_lea.vmem [#allocation2], %s2075_s24 }
 0x5e0   : > { %s1984_s20 = sshll.u32 %s432_s21, 4  ;;  %s2855_s20 = int_to_ptr.vmem [resolvable:$true] %s1984_s20 }
 0x5e1   : > { %s2342_s24 = scalar_lea.vmem %s2855_s20, 128 }
 0x5e2   : > { %1672 = vrot.lane.b32.xlu1 %v1667_v35, %s2418_s15  ;;  %p2343_p11 = scmp.ne.s32.totalorder %s2855_s20, %s2342_s24  ;;  %s2346_s15 = sshll.u32 %s2419_s30, 4  ;;  %s2347_s15 = int_to_ptr.vmem [resolvable:$false] %s2346_s15 }
 0x5e3   : > { %s2348_s2 = scalar_lea.vmem %s2347_s15, 256  ;;  %p2349_p0 = scmp.lt.s32.totalorder %s2855_s20, %s2347_s15 }
 0x5e4   : > { %p2344_p12 = pnand %p2343_p11, %p2528_p5  ;;  %p2350_p1 = scmp.lt.s32.totalorder %s2348_s2, %s2342_s24 }
 0x5e6   : > { %p2345_p13 = pneg %p2344_p12  ;;  %p2351_p2 = por %p2350_p1, %p2349_p0 }
 0x5e8   : > { %p2352_p3 = pnand %p2351_p2, %p2345_p13 }
 0x650   : > { %v1669_v7 = vpop.permute.xlu1 %1668  ;;  %v1671_v9 = vpop.permute.xlu0 %1670 }
 0x651   : > { %v1676_v44 = vsel %vm1051_vm2, %v1658_v4, %v1669_v7 }
 0x652   : > { %v1679_v10 = vsel %vm1677_vm5, %v1676_v44, %v1671_v9 }
 0x654   : > { %v1673_v55 = vpop.permute.xlu1 %1672 }
 0x655   : > { %v1682_v11 = vsel %vm1680_vm6, %v1679_v10, %v1673_v55 }
 0x656   : > { %2223 = vmatmul.mubr.msk.bf16.vlgmr.msra.gmra.mrb[12].mxu1 %vm453_vm0, %v1682_v11 }
 0x657   : > { %2250 = vmatprep.mubr.msk.bf16.mxu1 %vm2407_vm1, %v2406_v8  ;;  %2235 = vmatpush3.bf16.msra.mxu1 %v2312_v29 }
 0x658   : > { %2236 = vmatprep.subr.bf16.mxu1 %v2406_v8 }
 0x65b   : > { %2237 = vmatpush3.bf16.msra.mxu1 %v2313_v45 }
 0x65c   : > { %2238 = vmatprep.subr.bf16.mxu1 %v2406_v8 }
 0x65f   : > { %2239 = vmatpush3.bf16.msra.mxu1 %v2314_v30 }
 0x660   : > { %2240 = vmatprep.subr.bf16.mxu1 %v2406_v8 }
 0x663   : > { %2241 = vmatpush3.bf16.msra.mxu1 %v2315_v41 }
 0x664   : > { %2242 = vmatprep.subr.bf16.mxu1 %v2406_v8 }
 0x667   : > { %2243 = vmatpush3.bf16.msra.mxu1 %v2316_v42 }
 0x668   : > { %2244 = vmatprep.subr.bf16.mxu1 %v2406_v8 }
 0x66b   : > { %2245 = vmatpush3.bf16.msra.mxu1 %v2317_v43 }
 0x66c   : > { %2246 = vmatprep.subr.bf16.mxu1 %v2406_v8 }
 0x66f   : > { %2247 = vmatpush3.bf16.msra.mxu1 %v2318_v46 }
 0x670   : > { %2248 = vmatprep.subr.bf16.mxu1 %v2406_v8 }
 0x673   : > { %2249 = vmatpush3.bf16.msra.mxu1 %v2319_v47 }
 0x729   : > { %v1735_v12 = vpop.f32.mrb[12].mxu1 }
 0x72a   : > { %v1741_v14 = vadd.f32 %v1735_v12, %v2546_v0  ;;  %v2224_v15 = vpop.f32.mrb[13].mxu1  ;;  %v2310_v0 = vld [vmem:[%s2904_s8] sm:$0xff]  }
 0x72b   : > { %v1738_v17 = vpop.f32.mrb[14].mxu1  ;;  %2227 = vmatpush3.bf16.msra.mxu0 %v2310_v0 }
 0x72c   : > { %v2790_v18 = vadd.f32 %v2103_v13, %v1741_v14  ;;  %v2225_v19 = vpop.f32.mrb[15].mxu1  ;;  %2228 = vmatprep.subr.bf16.mxu0 %v2406_v8 }
 0x72e   : > { %v1752_v20 = vsel %vm453_vm0, %v2790_v18, 0.0 }
 0x72f   : > { %1753 = vadd.xlane.f32.xlu1 %v1752_v20  ;;  %2229 = vmatpush3.bf16.msra.mxu0 %v2311_v61 }
 0x7bc   : > { %v1754_v21 = vpop.xlane.xlu1 %1753 }
 0x7bd   : > { %v1755_v22 = vmul.f32 0.03125, %v1754_v21 }
 0x7bf   : > { %v1756_v23 = vsub.f32 %v2790_v18, %v1755_v22 }
 0x7c1   : > { %v1757_v24 = vmul.f32 %v1756_v23, %v1756_v23 }
 0x7c3   : > { %v1758_v28 = vsel %vm453_vm0, %v1757_v24, 0.0 }
 0x7c4   : > { %1759 = vadd.xlane.f32.xlu0 %v1758_v28 }
 0x851   : > { %v1760_v31 = vpop.xlane.xlu0 %1759 }
 0x852   : > { %v1761_v32 = vmul.f32 0.03125, %v1760_v31 }
 0x854   : > { %v1762_v33 = vadd.f32 1e-05, %v1761_v32 }
 0x856   : > { %2338 = vrsqrt.f32 %v1762_v33 }
 0x860   : > { %v2339_v34 = vpop.eup %2338 }
 0x861   : > { %v1764_v37 = vmul.f32 %v2339_v34, %v1756_v23 }
 0x863   : > { %v1771_v39 = vmul.f32 %v2104_v36, %v1764_v37 }
 0x865   : > { %v1778_v16 = vadd.f32 %v2105_v38, %v1771_v39 }
 0x867   : > { %v1779_v40 = vpack.c.bf16 %v1778_v16, %v1778_v16 }
 0x869   : > { %2231 = vmatmul.mubr.msk.bf16.vlgmr.msra.gmra.mrb[24].mxu0 %vm453_vm0, %v1779_v40 }
 0x93c   : > { %v1840_v53 = vpop.f32.mrb[24].mxu0 }
 0x93d   : > { %v1841_v54 = vadd.f32 %v2106_v51, %v1840_v53  ;;  %v2232_v56 = vpop.f32.mrb[25].mxu0 }
 0x93e   : > { %v1843_v57 = vpop.f32.mrb[26].mxu0 }
 0x93f   : > { %v1847_v58 = vmul.f32 0.70710677, %v1841_v54  ;;  %v2233_v59 = vpop.f32.mrb[27].mxu0  ;;  %v1846_v8 = vmul.f32 0.5, %v1841_v54 }
 0x941   : > { %2340 = verf.f32 %v1847_v58 }
 0x94b   : > { %v2341_v60 = vpop.eup %2340 }
 0x94c   : > { %v1849_v62 = vadd.f32 1.0, %v2341_v60 }
 0x94e   : > { %v1850_v63 = vmul.f32 %v1849_v62, %v1846_v8 }
 0x950   : > { %v1851_v1 = vpack.c.bf16 %v1850_v63, %v1850_v63 }
 0x952   : > { %2251 = vmatmul.mubr.bf16.vlgmr.msra.gmra.mrb[16].mxu1 %v1851_v1 }
 0xa25   : > { %v1957_v3 = vpop.f32.mrb[16].mxu1 }
 0xa26   : > { %v1958_v48 = vadd.f32 %v2110_v2, %v1957_v3  ;;  %v2252_v50 = vpop.f32.mrb[17].mxu1 }
 0xa27   : > { %v1960_v49 = vpop.f32.mrb[18].mxu1 }
 0xa28   : > { %v1963_v52 = vadd.f32 %v1958_v48, %v2790_v18  ;;  %v2253_v26 = vpop.f32.mrb[19].mxu1 }
 0xa2a   : > { %1964 = vst.msk [vmem:[%s432_s21] sm:$0xff] %vm453_vm0, %v1963_v52 }
 0xa2b   : > { %2355 = shalt.err (!%p2352_p3)
}
 0xa2c   : > { %s2356_s0 = scalar_lea.hbm %s2853_s1, 128  ;;  %s2360_s21 = scalar_lea.hbm %s2908_s12, 256 }
 0xa2d   : > { %p2357_p4 = scmp.ne.s32.totalorder %s2853_s1, %s2356_s0  ;;  %p2361_p9 = scmp.lt.u32.totalorder %s2853_s1, %s2908_s12 }
 0xa2e   : > { %p2362_p10 = scmp.lt.u32.totalorder %s2360_s21, %s2356_s0  ;;  %p2364_p12 = scmp.lt.u32.totalorder %s2356_s0, %s2853_s1 }
 0xa2f   : > { %p2358_p7 = pnand %p2357_p4, %p2528_p5 }
 0xa30   : > { %p2363_p11 = por %p2362_p10, %p2361_p9 }
 0xa31   : > { %p2359_p8 = pneg %p2358_p7 }
 0xa32   : > { %p2365_p13 = por %p2364_p12, %p2363_p11 }
 0xa34   : > { %p2366_p0 = pnand %p2365_p13, %p2359_p8 }
 0xa36   : > { %2369 = shalt.err (!%p2366_p0)
}
 0xa37   : > { %2254 = dma.vmem_to_hbm [thread:$0]  (%p2528_p5), %s2855_s20, 128, %s2853_s1, %s1966_s29  }
 0xa38 PF: > { %p2260_p1 = scmp.ge.s32.totalorder %s2404_s28, 2  ;;  %s1999_s2 = sand.u32 1, %s2392_s25  }
 0xa39   : > { %s2000_s24 = scalar_lea.sflag [#allocation3], %s1999_s2 }
 0xa3a   : > { %p2257_p2 = pnand %p2260_p1, %p2532_p6 }
 0xa3c   : > { %2387 = dma.done.wait (!%p2257_p2), %s2000_s24, 128  }
 0xa3d   : > { %2389 = vsyncadd (!%p2257_p2), %s2000_s24, 4294967168  ;;  %p24_p3 = scmp.ge.s32.totalorder %s2515_s14, 4   ;;  %s2918_s25 = smov %s2396_s26 }
 0xa3e   : > { %s2919_s26 = smov %s2400_s27  ;;  %s2920_s27 = smov %s2526_s17 }
 0xa3f   : > { %s2921_s28 = smov %s2515_s14  ;;  %26 = sbr.rel (!%p24_p3) target bundleno = 7 (0x7), region = 115 }
 0xa46   :  { %2013 = vsyncpa [#allocation3], 1 }
 0xa47   :  { %2015 = vsyncpa [#allocation3 + $0x1], 1 }

</bundles_post_ra>
